<compile_context>
chip_gen: v5e
topology: v5e:2x2
jax: 0.10.0
libtpu: 0.0.40
codegen_flags: <defaults>
</compile_context>

<pallas_src>
import math
import functools

import jax
import jax.numpy as jnp
from jax.experimental import pallas as pl
from jax.experimental.pallas import tpu as pltpu

BN_EPS = 1e-5
TILE_M = 512                     # output-tile width on the 128-lane axis
VMEM_LIMIT = 32 * 1024 * 1024    # conservative scoped-VMEM request (fits v5e/v6e/v7x)


def _round_up(x, m):
    return (x + m - 1) // m * m


# ------------------------------ Pallas kernels ----------------------------- #
def _matmul_stats_kernel(w_ref, p_ref, raw_ref, sum_ref, ssq_ref):
    """Pass 1: grouped, M-tiled conv-as-matmul + per-channel BN statistics.

    grid = (groups, m_tiles).  w_ref: [cg, kg] bf16, p_ref: [kg, tile_m] bf16.
    raw_ref: [cg, tile_m] f32 pre-BN conv output (lane-dense).
    sum_ref / ssq_ref: [cg, 1] f32 accumulators, resident across the M axis.
    """
    @pl.when(pl.program_id(1) == 0)
    def _():
        sum_ref[...] = jnp.zeros_like(sum_ref)
        ssq_ref[...] = jnp.zeros_like(ssq_ref)

    # bf16 MXU feed, f32 accumulation.
    y = jnp.dot(w_ref[...], p_ref[...], preferred_element_type=jnp.float32)
    raw_ref[...] = y
    sum_ref[...] += jnp.sum(y, axis=1, keepdims=True)
    ssq_ref[...] += jnp.sum(y * y, axis=1, keepdims=True)


def _bn_relu_kernel(mean_ref, inv_ref, raw_ref, act_ref):
    """Pass 2: act = relu((raw - mean) * inv_std) on lane-dense [Cout, tile_m]."""
    act_ref[...] = jnp.maximum(
        (raw_ref[...] - mean_ref[...]) * inv_ref[...], 0.0)


# ------------------------------ host-side glue ----------------------------- #
def _im2col_t(x_cnhw, rf, stride):
    """Channels-first im2col: [C, N, H, W] -> [C*rf*rf, N*Ho*Wo].

    K-row order is (ci, kh, kw) so the channel groups of a grouped conv occupy
    contiguous row ranges.  Input is already bf16 to halve HBM traffic.
    """
    C, N, H, W = x_cnhw.shape
    pad = (rf - 1) // 2
    Ho = (H + 2 * pad - rf) // stride + 1
    Wo = (W + 2 * pad - rf) // stride + 1
    if rf == 1 and stride == 1:
        return x_cnhw.reshape(C, N * H * W), Ho, Wo
    xp = jnp.pad(x_cnhw, ((0, 0), (0, 0), (pad, pad), (pad, pad)))
    taps = []
    for kh in range(rf):
        for kw in range(rf):
            taps.append(
                xp[:, :, kh:kh + stride * Ho:stride, kw:kw + stride * Wo:stride])
    # TODO(synk): for large spatial extents, build the rf*rf taps inside the
    # kernel (implicit GEMM over a DMA'd padded spatial tile) to avoid the
    # ~9x HBM im2col blow-up for 3x3 convs.
    p = jnp.stack(taps, axis=1)                      # [C, rf*rf, N, Ho, Wo]
    return p.reshape(C * rf * rf, N * Ho * Wo), Ho, Wo


def conv_bn_relu(x_cnhw, w_t_stack, rf, stride):
    """Conv2d(pad=(rf-1)//2, stride, groups, no bias) + BatchNorm(train) + ReLU.

    x_cnhw    : [Cin, N, H, W] float32 activations (channels-first).
    w_t_stack : [groups, cg_out, cg_in*rf*rf] bf16 weights, K ordered (ci,kh,kw).
    Returns (raw, act), both [Cout, N, Ho, Wo] float32 (raw = pre-BN output).
    """
    Cin, N, H, W = x_cnhw.shape
    groups, cg, kg = w_t_stack.shape
    cout = groups * cg

    patches_t, Ho, Wo = _im2col_t(x_cnhw.astype(jnp.bfloat16), rf, stride)
    K = patches_t.shape[0]
    assert K == groups * kg, (K, groups, kg)
    M = N * Ho * Wo

    tile_m = min(TILE_M, _round_up(M, 128))
    Mp = _round_up(M, tile_m)
    n_tiles = Mp // tile_m
    if Mp != M:
        # zero columns contribute 0 to sum / sum-of-squares; divisor stays M.
        patches_t = jnp.pad(patches_t, ((0, 0), (0, Mp - M)))
    # Put each channel-group on its own leading plane: every kernel block then
    # covers the full K extent (no packed-dtype sublane-offset issues) and the
    # 'groups' grid axis indexes it directly.
    patches_g = patches_t.reshape(groups, kg, Mp)

    raw_t, sums, ssq = pl.pallas_call(
        _matmul_stats_kernel,
        grid=(groups, n_tiles),
        in_specs=[
            pl.BlockSpec((None, cg, kg), lambda g, i: (g, 0, 0)),
            pl.BlockSpec((None, kg, tile_m), lambda g, i: (g, 0, i)),
        ],
        out_specs=(
            pl.BlockSpec((cg, tile_m), lambda g, i: (g, i)),
            pl.BlockSpec((cg, 1), lambda g, i: (g, 0)),
            pl.BlockSpec((cg, 1), lambda g, i: (g, 0)),
        ),
        out_shape=(
            jax.ShapeDtypeStruct((cout, Mp), jnp.float32),
            jax.ShapeDtypeStruct((cout, 1), jnp.float32),
            jax.ShapeDtypeStruct((cout, 1), jnp.float32),
        ),
        compiler_params=pltpu.CompilerParams(
            dimension_semantics=("parallel", "arbitrary"),
            vmem_limit_bytes=VMEM_LIMIT,
        ),
    )(w_t_stack, patches_g)

    # Tiny O(Cout) BN finalization (training-mode batch stats, gamma=1, beta=0).
    mean = sums / float(M)
    var = jnp.maximum(ssq / float(M) - mean * mean, 0.0)
    inv_std = jax.lax.rsqrt(var + BN_EPS)

    act_t = pl.pallas_call(
        _bn_relu_kernel,
        grid=(n_tiles,),
        in_specs=[
            pl.BlockSpec((cout, 1), lambda i: (0, 0)),
            pl.BlockSpec((cout, 1), lambda i: (0, 0)),
            pl.BlockSpec((cout, tile_m), lambda i: (0, i)),
        ],
        out_specs=pl.BlockSpec((cout, tile_m), lambda i: (0, i)),
        out_shape=jax.ShapeDtypeStruct((cout, Mp), jnp.float32),
        compiler_params=pltpu.CompilerParams(
            dimension_semantics=("parallel",),
            vmem_limit_bytes=VMEM_LIMIT,
        ),
    )(mean, inv_std, raw_t)

    raw = raw_t[:, :M].reshape(cout, N, Ho, Wo)
    act = act_t[:, :M].reshape(cout, N, Ho, Wo)
    return raw, act


# --------------------------- parameter creation ---------------------------- #
def _msr_uniform(key, hwio_shape, alpha=0.0, weight_scale=1.0):
    """MSRInitializer: U(-b, b), b = sqrt(3)*gain/sqrt(fan_out)*scale."""
    r1, r2, _, cout = hwio_shape
    fan_out = cout * r1 * r2
    gain = math.sqrt(2.0 / (1.0 + alpha ** 2))
    bound = math.sqrt(3.0) * gain / math.sqrt(fan_out) * weight_scale
    return jax.random.uniform(key, hwio_shape, jnp.float32, -bound, bound)


def _hwio_to_tstack(w_hwio):
    """[R, R, Ci, Co] -> [1, Co, Ci*R*R] bf16 with K ordered (ci, kh, kw)."""
    r1, r2, ci, co = w_hwio.shape
    w = jnp.transpose(w_hwio, (3, 2, 0, 1)).reshape(co, ci * r1 * r2)
    return w[None].astype(jnp.bfloat16)


def init_downsample_params(key, in_ch, out_ch, k=8, reduce=1):
    n_filters = (out_ch - in_ch) // k
    ext = []
    # ExtensionLayer: n_filters x (1x1 bottleneck, 3x3 transform), no bias (BN).
    for _ in range(n_filters):
        key, k1, k2 = jax.random.split(key, 3)
        w1 = _msr_uniform(k1, (1, 1, in_ch, k))
        w3 = _msr_uniform(k2, (3, 3, k, k))
        ext.append((_hwio_to_tstack(w1), _hwio_to_tstack(w3)))

    # ShrinkingLayer: grouped Conv2d(out_ch, out_ch, 3, stride=2, pad=1,
    # groups=out_ch//k//reduce).  Kept as per-group weights (NOT densified).
    groups = out_ch // k // reduce
    cg = out_ch // groups
    key, kgrp = jax.random.split(key)
    bound = math.sqrt(3.0) * math.sqrt(2.0) / math.sqrt(out_ch * 9)  # MSR fan_out
    w_group = jax.random.uniform(kgrp, (groups, 3, 3, cg, cg), jnp.float32,
                                 -bound, bound)
    shrink = jnp.transpose(w_group, (0, 4, 3, 1, 2)).reshape(groups, cg, cg * 9)
    return {"k": k, "extension": ext, "shrink": shrink.astype(jnp.bfloat16)}


# ------------------------------- forward ----------------------------------- #
def downsample_forward(params, x_nchw):
    """DownsampleLayer.forward: returns [raw, activated] of the shrink conv (NCHW)."""
    k = params["k"]
    x_t = jnp.transpose(x_nchw, (1, 0, 2, 3))      # NCHW -> CNHW (channels-first)

    # SequentialConvolutionalLayer (Windowed=True, Shortcut=None):
    # each filter: 1x1 bottleneck -> BN -> ReLU -> 3x3 transform -> BN -> ReLU,
    # reading a sliding in_ch-channel window; only activated outputs are kept.
    window = x_t
    activated = []
    for (w1_t, w3_t) in params["extension"]:
        _, a1 = conv_bn_relu(window, w1_t, rf=1, stride=1)
        _, a2 = conv_bn_relu(a1, w3_t, rf=3, stride=1)
        activated.append(a2)
        # TODO(synk): replace the sliding-window recopy with a channel ring
        # buffer + rolled 1x1 weights so only the k new channels move per step.
        window = jnp.concatenate([window[k:], a2], axis=0)

    # cat([x, ActivatedFeatures], channel)
    full = jnp.concatenate([x_t] + activated, axis=0)       # [out_ch, N, H, W]

    # ShrinkingLayer: grouped 3x3 stride-2 conv + BN + ReLU -> [raw, activated]
    raw, act = conv_bn_relu(full, params["shrink"], rf=3, stride=2)
    return (jnp.transpose(raw, (1, 0, 2, 3)),
            jnp.transpose(act, (1, 0, 2, 3)))


# --------------------------------- demo ------------------------------------ #
if __name__ == "__main__":
    key = jax.random.PRNGKey(0)
    kx, kp = jax.random.split(key)

    N, Cin, H, W = 2, 16, 16, 16          # x is NCHW like PyTorch
    Cout, k = 32, 8                        # DownsampleLayer(16, 32, k=8)

    x = jax.random.normal(kx, (N, Cin, H, W), jnp.float32)
    params = init_downsample_params(kp, Cin, Cout, k=k, reduce=1)

    fwd = jax.jit(functools.partial(downsample_forward, params))
    raw, act = fwd(x)
    jax.block_until_ready((raw, act))

    assert raw.shape == (N, Cout, H // 2, W // 2), raw.shape
    assert act.shape == (N, Cout, H // 2, W // 2), act.shape
    assert bool(jnp.all(jnp.isfinite(raw))) and bool(jnp.all(jnp.isfinite(act)))
    assert bool(jnp.all(act >= 0.0))
    print("KERNEL_OK")
</pallas_src>

<mosaic_0001>
module attributes {stable_mosaic.version = 11 : i64} {
  func.func @_matmul_stats_kernel(%arg0: i32, %arg1: i32, %arg2: memref<1x8x16xbf16, #tpu.memory_space<vmem>>, %arg3: memref<1x16x512xbf16, #tpu.memory_space<vmem>>, %arg4: memref<8x512xf32, #tpu.memory_space<vmem>>, %arg5: memref<8x1xf32, #tpu.memory_space<vmem>>, %arg6: memref<8x1xf32, #tpu.memory_space<vmem>>) attributes {dimension_semantics = [#tpu.dimension_semantics<parallel>, #tpu.dimension_semantics<arbitrary>], iteration_bounds = array<i64: 1, 1>, scalar_prefetch = 0 : i64, scratch_operands = 0 : i64, tpu.core_type = #tpu.core_type<tc>, window_params = [{transform_indices = @transform_0, window_bounds = array<i64: 1, 8, 16>}, {transform_indices = @transform_1, window_bounds = array<i64: 1, 16, 512>}, {transform_indices = @transform_2, window_bounds = array<i64: 8, 512>}, {transform_indices = @transform_3, window_bounds = array<i64: 8, 1>}, {transform_indices = @transform_4, window_bounds = array<i64: 8, 1>}]} {
    %c0_i32 = arith.constant 0 : i32
    %0 = arith.cmpi eq, %arg1, %c0_i32 : i32
    %1 = arith.extui %0 : i1 to i32
    %c0_i32_0 = arith.constant 0 : i32
    %2 = arith.cmpi ne, %1, %c0_i32_0 : i32
    scf.if %2 {
      %cst_18 = arith.constant 0.000000e+00 : f32
      %20 = vector.broadcast %cst_18 : f32 to vector<8x1xf32>
      %c0_19 = arith.constant 0 : index
      %c0_20 = arith.constant 0 : index
      %21 = vector.load %arg5[%c0_19, %c0_20] : memref<8x1xf32, #tpu.memory_space<vmem>>, vector<8x1xf32>
      tpu.vector_store %arg5[%c0_19, %c0_20], %20 {strides = array<i32>} : memref<8x1xf32, #tpu.memory_space<vmem>>, vector<8x1xf32>,
      %cst_21 = arith.constant 0.000000e+00 : f32
      %22 = vector.broadcast %cst_21 : f32 to vector<8x1xf32>
      %c0_22 = arith.constant 0 : index
      %c0_23 = arith.constant 0 : index
      %23 = vector.load %arg6[%c0_22, %c0_23] : memref<8x1xf32, #tpu.memory_space<vmem>>, vector<8x1xf32>
      tpu.vector_store %arg6[%c0_22, %c0_23], %22 {strides = array<i32>} : memref<8x1xf32, #tpu.memory_space<vmem>>, vector<8x1xf32>,
    } else {
    }
    %c0 = arith.constant 0 : index
    %c0_1 = arith.constant 0 : index
    %c0_2 = arith.constant 0 : index
    %3 = vector.load %arg2[%c0, %c0_1, %c0_2] : memref<1x8x16xbf16, #tpu.memory_space<vmem>>, vector<1x8x16xbf16>
    %4 = vector.shape_cast %3 : vector<1x8x16xbf16> to vector<8x16xbf16>
    %c0_3 = arith.constant 0 : index
    %c0_4 = arith.constant 0 : index
    %c0_5 = arith.constant 0 : index
    %5 = vector.load %arg3[%c0_3, %c0_4, %c0_5] : memref<1x16x512xbf16, #tpu.memory_space<vmem>>, vector<1x16x512xbf16>
    %6 = vector.shape_cast %5 : vector<1x16x512xbf16> to vector<16x512xbf16>
    %cst = arith.constant dense<0.000000e+00> : vector<8x512xf32>
    %7 = tpu.matmul %4, %6, %cst {dimension_numbers = #tpu.dot_dimension_numbers<[1], [0], [0], [1], [0, 0, 1, 1], [], []>} : vector<8x16xbf16>, vector<16x512xbf16>, vector<8x512xf32> -> vector<8x512xf32>
    %c0_6 = arith.constant 0 : index
    %c0_7 = arith.constant 0 : index
    %8 = vector.load %arg4[%c0_6, %c0_7] : memref<8x512xf32, #tpu.memory_space<vmem>>, vector<8x512xf32>
    tpu.vector_store %arg4[%c0_6, %c0_7], %7 {strides = array<i32>} : memref<8x512xf32, #tpu.memory_space<vmem>>, vector<8x512xf32>,
    %c0_8 = arith.constant 0 : index
    %c0_9 = arith.constant 0 : index
    %9 = vector.load %arg5[%c0_8, %c0_9] : memref<8x1xf32, #tpu.memory_space<vmem>>, vector<8x1xf32>
    %cst_10 = arith.constant dense<0.000000e+00> : vector<8xf32>
    %10 = vector.multi_reduction <add>, %7, %cst_10 [1] : vector<8x512xf32> to vector<8xf32>
    %11 = vector.shape_cast %10 : vector<8xf32> to vector<8x1xf32>
    %12 = arith.addf %9, %11 : vector<8x1xf32>
    %c0_11 = arith.constant 0 : index
    %c0_12 = arith.constant 0 : index
    %13 = vector.load %arg5[%c0_11, %c0_12] : memref<8x1xf32, #tpu.memory_space<vmem>>, vector<8x1xf32>
    tpu.vector_store %arg5[%c0_11, %c0_12], %12 {strides = array<i32>} : memref<8x1xf32, #tpu.memory_space<vmem>>, vector<8x1xf32>,
    %c0_13 = arith.constant 0 : index
    %c0_14 = arith.constant 0 : index
    %14 = vector.load %arg6[%c0_13, %c0_14] : memref<8x1xf32, #tpu.memory_space<vmem>>, vector<8x1xf32>
    %15 = arith.mulf %7, %7 : vector<8x512xf32>
    %cst_15 = arith.constant dense<0.000000e+00> : vector<8xf32>
    %16 = vector.multi_reduction <add>, %15, %cst_15 [1] : vector<8x512xf32> to vector<8xf32>
    %17 = vector.shape_cast %16 : vector<8xf32> to vector<8x1xf32>
    %18 = arith.addf %14, %17 : vector<8x1xf32>
    %c0_16 = arith.constant 0 : index
    %c0_17 = arith.constant 0 : index
    %19 = vector.load %arg6[%c0_16, %c0_17] : memref<8x1xf32, #tpu.memory_space<vmem>>, vector<8x1xf32>
    tpu.vector_store %arg6[%c0_16, %c0_17], %18 {strides = array<i32>} : memref<8x1xf32, #tpu.memory_space<vmem>>, vector<8x1xf32>,
    return
  }
  func.func @transform_0(%arg0: i32, %arg1: i32) -> (i32, i32, i32) {
    %c0_i32 = arith.constant 0 : i32
    %c0_i32_0 = arith.constant 0 : i32
    %c0_i32_1 = arith.constant 0 : i32
    return %arg0, %c0_i32, %c0_i32_0 : i32, i32, i32
  }
  func.func @transform_1(%arg0: i32, %arg1: i32) -> (i32, i32, i32) {
    %c0_i32 = arith.constant 0 : i32
    %c0_i32_0 = arith.constant 0 : i32
    return %arg0, %c0_i32, %arg1 : i32, i32, i32
  }
  func.func @transform_2(%arg0: i32, %arg1: i32) -> (i32, i32) {
    %c0_i32 = arith.constant 0 : i32
    return %arg0, %arg1 : i32, i32
  }
  func.func @transform_3(%arg0: i32, %arg1: i32) -> (i32, i32) {
    %c0_i32 = arith.constant 0 : i32
    %c0_i32_0 = arith.constant 0 : i32
    return %arg0, %c0_i32 : i32, i32
  }
  func.func @transform_4(%arg0: i32, %arg1: i32) -> (i32, i32) {
    %c0_i32 = arith.constant 0 : i32
    %c0_i32_0 = arith.constant 0 : i32
    return %arg0, %c0_i32 : i32, i32
  }
}

module attributes {stable_mosaic.version = 11 : i64} {
  func.func @_bn_relu_kernel(%arg0: i32, %arg1: memref<8x1xf32, #tpu.memory_space<vmem>>, %arg2: memref<8x1xf32, #tpu.memory_space<vmem>>, %arg3: memref<8x512xf32, #tpu.memory_space<vmem>>, %arg4: memref<8x512xf32, #tpu.memory_space<vmem>>) attributes {dimension_semantics = [#tpu.dimension_semantics<parallel>], iteration_bounds = array<i64: 1>, scalar_prefetch = 0 : i64, scratch_operands = 0 : i64, tpu.core_type = #tpu.core_type<tc>, window_params = [{pipeline_mode = #tpu.pipeline_mode<synchronous>, transform_indices = @transform_0, window_bounds = array<i64: 8, 1>}, {pipeline_mode = #tpu.pipeline_mode<synchronous>, transform_indices = @transform_1, window_bounds = array<i64: 8, 1>}, {transform_indices = @transform_2, window_bounds = array<i64: 8, 512>}, {transform_indices = @transform_3, window_bounds = array<i64: 8, 512>}]} {
    %c0 = arith.constant 0 : index
    %c0_0 = arith.constant 0 : index
    %0 = vector.load %arg3[%c0, %c0_0] : memref<8x512xf32, #tpu.memory_space<vmem>>, vector<8x512xf32>
    %c0_1 = arith.constant 0 : index
    %c0_2 = arith.constant 0 : index
    %1 = vector.load %arg1[%c0_1, %c0_2] : memref<8x1xf32, #tpu.memory_space<vmem>>, vector<8x1xf32>
    %2 = vector.broadcast %1 : vector<8x1xf32> to vector<8x512xf32>
    %3 = arith.subf %0, %2 : vector<8x512xf32>
    %c0_3 = arith.constant 0 : index
    %c0_4 = arith.constant 0 : index
    %4 = vector.load %arg2[%c0_3, %c0_4] : memref<8x1xf32, #tpu.memory_space<vmem>>, vector<8x1xf32>
    %5 = vector.broadcast %4 : vector<8x1xf32> to vector<8x512xf32>
    %6 = arith.mulf %3, %5 : vector<8x512xf32>
    %cst = arith.constant 0.000000e+00 : f32
    %7 = vector.broadcast %cst : f32 to vector<8x512xf32>
    %8 = arith.maximumf %6, %7 : vector<8x512xf32>
    %c0_5 = arith.constant 0 : index
    %c0_6 = arith.constant 0 : index
    %9 = vector.load %arg4[%c0_5, %c0_6] : memref<8x512xf32, #tpu.memory_space<vmem>>, vector<8x512xf32>
    tpu.vector_store %arg4[%c0_5, %c0_6], %8 {strides = array<i32>} : memref<8x512xf32, #tpu.memory_space<vmem>>, vector<8x512xf32>,
    return
  }
  func.func @transform_0(%arg0: i32) -> (i32, i32) {
    %c0_i32 = arith.constant 0 : i32
    %c0_i32_0 = arith.constant 0 : i32
    %c0_i32_1 = arith.constant 0 : i32
    return %c0_i32, %c0_i32_0 : i32, i32
  }
  func.func @transform_1(%arg0: i32) -> (i32, i32) {
    %c0_i32 = arith.constant 0 : i32
    %c0_i32_0 = arith.constant 0 : i32
    %c0_i32_1 = arith.constant 0 : i32
    return %c0_i32, %c0_i32_0 : i32, i32
  }
  func.func @transform_2(%arg0: i32) -> (i32, i32) {
    %c0_i32 = arith.constant 0 : i32
    %c0_i32_0 = arith.constant 0 : i32
    return %c0_i32, %arg0 : i32, i32
  }
  func.func @transform_3(%arg0: i32) -> (i32, i32) {
    %c0_i32 = arith.constant 0 : i32
    %c0_i32_0 = arith.constant 0 : i32
    return %c0_i32, %arg0 : i32, i32
  }
}

module attributes {stable_mosaic.version = 11 : i64} {
  func.func @_matmul_stats_kernel(%arg0: i32, %arg1: i32, %arg2: memref<1x8x72xbf16, #tpu.memory_space<vmem>>, %arg3: memref<1x72x512xbf16, #tpu.memory_space<vmem>>, %arg4: memref<8x512xf32, #tpu.memory_space<vmem>>, %arg5: memref<8x1xf32, #tpu.memory_space<vmem>>, %arg6: memref<8x1xf32, #tpu.memory_space<vmem>>) attributes {dimension_semantics = [#tpu.dimension_semantics<parallel>, #tpu.dimension_semantics<arbitrary>], iteration_bounds = array<i64: 1, 1>, scalar_prefetch = 0 : i64, scratch_operands = 0 : i64, tpu.core_type = #tpu.core_type<tc>, window_params = [{transform_indices = @transform_0, window_bounds = array<i64: 1, 8, 72>}, {transform_indices = @transform_1, window_bounds = array<i64: 1, 72, 512>}, {transform_indices = @transform_2, window_bounds = array<i64: 8, 512>}, {transform_indices = @transform_3, window_bounds = array<i64: 8, 1>}, {transform_indices = @transform_4, window_bounds = array<i64: 8, 1>}]} {
    %c0_i32 = arith.constant 0 : i32
    %0 = arith.cmpi eq, %arg1, %c0_i32 : i32
    %1 = arith.extui %0 : i1 to i32
    %c0_i32_0 = arith.constant 0 : i32
    %2 = arith.cmpi ne, %1, %c0_i32_0 : i32
    scf.if %2 {
      %cst_18 = arith.constant 0.000000e+00 : f32
      %20 = vector.broadcast %cst_18 : f32 to vector<8x1xf32>
      %c0_19 = arith.constant 0 : index
      %c0_20 = arith.constant 0 : index
      %21 = vector.load %arg5[%c0_19, %c0_20] : memref<8x1xf32, #tpu.memory_space<vmem>>, vector<8x1xf32>
      tpu.vector_store %arg5[%c0_19, %c0_20], %20 {strides = array<i32>} : memref<8x1xf32, #tpu.memory_space<vmem>>, vector<8x1xf32>,
      %cst_21 = arith.constant 0.000000e+00 : f32
      %22 = vector.broadcast %cst_21 : f32 to vector<8x1xf32>
      %c0_22 = arith.constant 0 : index
      %c0_23 = arith.constant 0 : index
      %23 = vector.load %arg6[%c0_22, %c0_23] : memref<8x1xf32, #tpu.memory_space<vmem>>, vector<8x1xf32>
      tpu.vector_store %arg6[%c0_22, %c0_23], %22 {strides = array<i32>} : memref<8x1xf32, #tpu.memory_space<vmem>>, vector<8x1xf32>,
    } else {
    }
    %c0 = arith.constant 0 : index
    %c0_1 = arith.constant 0 : index
    %c0_2 = arith.constant 0 : index
    %3 = vector.load %arg2[%c0, %c0_1, %c0_2] : memref<1x8x72xbf16, #tpu.memory_space<vmem>>, vector<1x8x72xbf16>
    %4 = vector.shape_cast %3 : vector<1x8x72xbf16> to vector<8x72xbf16>
    %c0_3 = arith.constant 0 : index
    %c0_4 = arith.constant 0 : index
    %c0_5 = arith.constant 0 : index
    %5 = vector.load %arg3[%c0_3, %c0_4, %c0_5] : memref<1x72x512xbf16, #tpu.memory_space<vmem>>, vector<1x72x512xbf16>
    %6 = vector.shape_cast %5 : vector<1x72x512xbf16> to vector<72x512xbf16>
    %cst = arith.constant dense<0.000000e+00> : vector<8x512xf32>
    %7 = tpu.matmul %4, %6, %cst {dimension_numbers = #tpu.dot_dimension_numbers<[1], [0], [0], [1], [0, 0, 1, 1], [], []>} : vector<8x72xbf16>, vector<72x512xbf16>, vector<8x512xf32> -> vector<8x512xf32>
    %c0_6 = arith.constant 0 : index
    %c0_7 = arith.constant 0 : index
    %8 = vector.load %arg4[%c0_6, %c0_7] : memref<8x512xf32, #tpu.memory_space<vmem>>, vector<8x512xf32>
    tpu.vector_store %arg4[%c0_6, %c0_7], %7 {strides = array<i32>} : memref<8x512xf32, #tpu.memory_space<vmem>>, vector<8x512xf32>,
    %c0_8 = arith.constant 0 : index
    %c0_9 = arith.constant 0 : index
    %9 = vector.load %arg5[%c0_8, %c0_9] : memref<8x1xf32, #tpu.memory_space<vmem>>, vector<8x1xf32>
    %cst_10 = arith.constant dense<0.000000e+00> : vector<8xf32>
    %10 = vector.multi_reduction <add>, %7, %cst_10 [1] : vector<8x512xf32> to vector<8xf32>
    %11 = vector.shape_cast %10 : vector<8xf32> to vector<8x1xf32>
    %12 = arith.addf %9, %11 : vector<8x1xf32>
    %c0_11 = arith.constant 0 : index
    %c0_12 = arith.constant 0 : index
    %13 = vector.load %arg5[%c0_11, %c0_12] : memref<8x1xf32, #tpu.memory_space<vmem>>, vector<8x1xf32>
    tpu.vector_store %arg5[%c0_11, %c0_12], %12 {strides = array<i32>} : memref<8x1xf32, #tpu.memory_space<vmem>>, vector<8x1xf32>,
    %c0_13 = arith.constant 0 : index
    %c0_14 = arith.constant 0 : index
    %14 = vector.load %arg6[%c0_13, %c0_14] : memref<8x1xf32, #tpu.memory_space<vmem>>, vector<8x1xf32>
    %15 = arith.mulf %7, %7 : vector<8x512xf32>
    %cst_15 = arith.constant dense<0.000000e+00> : vector<8xf32>
    %16 = vector.multi_reduction <add>, %15, %cst_15 [1] : vector<8x512xf32> to vector<8xf32>
    %17 = vector.shape_cast %16 : vector<8xf32> to vector<8x1xf32>
    %18 = arith.addf %14, %17 : vector<8x1xf32>
    %c0_16 = arith.constant 0 : index
    %c0_17 = arith.constant 0 : index
    %19 = vector.load %arg6[%c0_16, %c0_17] : memref<8x1xf32, #tpu.memory_space<vmem>>, vector<8x1xf32>
    tpu.vector_store %arg6[%c0_16, %c0_17], %18 {strides = array<i32>} : memref<8x1xf32, #tpu.memory_space<vmem>>, vector<8x1xf32>,
    return
  }
  func.func @transform_0(%arg0: i32, %arg1: i32) -> (i32, i32, i32) {
    %c0_i32 = arith.constant 0 : i32
    %c0_i32_0 = arith.constant 0 : i32
    %c0_i32_1 = arith.constant 0 : i32
    return %arg0, %c0_i32, %c0_i32_0 : i32, i32, i32
  }
  func.func @transform_1(%arg0: i32, %arg1: i32) -> (i32, i32, i32) {
    %c0_i32 = arith.constant 0 : i32
    %c0_i32_0 = arith.constant 0 : i32
    return %arg0, %c0_i32, %arg1 : i32, i32, i32
  }
  func.func @transform_2(%arg0: i32, %arg1: i32) -> (i32, i32) {
    %c0_i32 = arith.constant 0 : i32
    return %arg0, %arg1 : i32, i32
  }
  func.func @transform_3(%arg0: i32, %arg1: i32) -> (i32, i32) {
    %c0_i32 = arith.constant 0 : i32
    %c0_i32_0 = arith.constant 0 : i32
    return %arg0, %c0_i32 : i32, i32
  }
  func.func @transform_4(%arg0: i32, %arg1: i32) -> (i32, i32) {
    %c0_i32 = arith.constant 0 : i32
    %c0_i32_0 = arith.constant 0 : i32
    return %arg0, %c0_i32 : i32, i32
  }
}

module attributes {stable_mosaic.version = 11 : i64} {
  func.func @_matmul_stats_kernel(%arg0: i32, %arg1: i32, %arg2: memref<1x8x16xbf16, #tpu.memory_space<vmem>>, %arg3: memref<1x16x512xbf16, #tpu.memory_space<vmem>>, %arg4: memref<8x512xf32, #tpu.memory_space<vmem>>, %arg5: memref<8x1xf32, #tpu.memory_space<vmem>>, %arg6: memref<8x1xf32, #tpu.memory_space<vmem>>) attributes {dimension_semantics = [#tpu.dimension_semantics<parallel>, #tpu.dimension_semantics<arbitrary>], iteration_bounds = array<i64: 1, 1>, scalar_prefetch = 0 : i64, scratch_operands = 0 : i64, tpu.core_type = #tpu.core_type<tc>, window_params = [{transform_indices = @transform_0, window_bounds = array<i64: 1, 8, 16>}, {transform_indices = @transform_1, window_bounds = array<i64: 1, 16, 512>}, {transform_indices = @transform_2, window_bounds = array<i64: 8, 512>}, {transform_indices = @transform_3, window_bounds = array<i64: 8, 1>}, {transform_indices = @transform_4, window_bounds = array<i64: 8, 1>}]} {
    %c0_i32 = arith.constant 0 : i32
    %0 = arith.cmpi eq, %arg1, %c0_i32 : i32
    %1 = arith.extui %0 : i1 to i32
    %c0_i32_0 = arith.constant 0 : i32
    %2 = arith.cmpi ne, %1, %c0_i32_0 : i32
    scf.if %2 {
      %cst_18 = arith.constant 0.000000e+00 : f32
      %20 = vector.broadcast %cst_18 : f32 to vector<8x1xf32>
      %c0_19 = arith.constant 0 : index
      %c0_20 = arith.constant 0 : index
      %21 = vector.load %arg5[%c0_19, %c0_20] : memref<8x1xf32, #tpu.memory_space<vmem>>, vector<8x1xf32>
      tpu.vector_store %arg5[%c0_19, %c0_20], %20 {strides = array<i32>} : memref<8x1xf32, #tpu.memory_space<vmem>>, vector<8x1xf32>,
      %cst_21 = arith.constant 0.000000e+00 : f32
      %22 = vector.broadcast %cst_21 : f32 to vector<8x1xf32>
      %c0_22 = arith.constant 0 : index
      %c0_23 = arith.constant 0 : index
      %23 = vector.load %arg6[%c0_22, %c0_23] : memref<8x1xf32, #tpu.memory_space<vmem>>, vector<8x1xf32>
      tpu.vector_store %arg6[%c0_22, %c0_23], %22 {strides = array<i32>} : memref<8x1xf32, #tpu.memory_space<vmem>>, vector<8x1xf32>,
    } else {
    }
    %c0 = arith.constant 0 : index
    %c0_1 = arith.constant 0 : index
    %c0_2 = arith.constant 0 : index
    %3 = vector.load %arg2[%c0, %c0_1, %c0_2] : memref<1x8x16xbf16, #tpu.memory_space<vmem>>, vector<1x8x16xbf16>
    %4 = vector.shape_cast %3 : vector<1x8x16xbf16> to vector<8x16xbf16>
    %c0_3 = arith.constant 0 : index
    %c0_4 = arith.constant 0 : index
    %c0_5 = arith.constant 0 : index
    %5 = vector.load %arg3[%c0_3, %c0_4, %c0_5] : memref<1x16x512xbf16, #tpu.memory_space<vmem>>, vector<1x16x512xbf16>
    %6 = vector.shape_cast %5 : vector<1x16x512xbf16> to vector<16x512xbf16>
    %cst = arith.constant dense<0.000000e+00> : vector<8x512xf32>
    %7 = tpu.matmul %4, %6, %cst {dimension_numbers = #tpu.dot_dimension_numbers<[1], [0], [0], [1], [0, 0, 1, 1], [], []>} : vector<8x16xbf16>, vector<16x512xbf16>, vector<8x512xf32> -> vector<8x512xf32>
    %c0_6 = arith.constant 0 : index
    %c0_7 = arith.constant 0 : index
    %8 = vector.load %arg4[%c0_6, %c0_7] : memref<8x512xf32, #tpu.memory_space<vmem>>, vector<8x512xf32>
    tpu.vector_store %arg4[%c0_6, %c0_7], %7 {strides = array<i32>} : memref<8x512xf32, #tpu.memory_space<vmem>>, vector<8x512xf32>,
    %c0_8 = arith.constant 0 : index
    %c0_9 = arith.constant 0 : index
    %9 = vector.load %arg5[%c0_8, %c0_9] : memref<8x1xf32, #tpu.memory_space<vmem>>, vector<8x1xf32>
    %cst_10 = arith.constant dense<0.000000e+00> : vector<8xf32>
    %10 = vector.multi_reduction <add>, %7, %cst_10 [1] : vector<8x512xf32> to vector<8xf32>
    %11 = vector.shape_cast %10 : vector<8xf32> to vector<8x1xf32>
    %12 = arith.addf %9, %11 : vector<8x1xf32>
    %c0_11 = arith.constant 0 : index
    %c0_12 = arith.constant 0 : index
    %13 = vector.load %arg5[%c0_11, %c0_12] : memref<8x1xf32, #tpu.memory_space<vmem>>, vector<8x1xf32>
    tpu.vector_store %arg5[%c0_11, %c0_12], %12 {strides = array<i32>} : memref<8x1xf32, #tpu.memory_space<vmem>>, vector<8x1xf32>,
    %c0_13 = arith.constant 0 : index
    %c0_14 = arith.constant 0 : index
    %14 = vector.load %arg6[%c0_13, %c0_14] : memref<8x1xf32, #tpu.memory_space<vmem>>, vector<8x1xf32>
    %15 = arith.mulf %7, %7 : vector<8x512xf32>
    %cst_15 = arith.constant dense<0.000000e+00> : vector<8xf32>
    %16 = vector.multi_reduction <add>, %15, %cst_15 [1] : vector<8x512xf32> to vector<8xf32>
    %17 = vector.shape_cast %16 : vector<8xf32> to vector<8x1xf32>
    %18 = arith.addf %14, %17 : vector<8x1xf32>
    %c0_16 = arith.constant 0 : index
    %c0_17 = arith.constant 0 : index
    %19 = vector.load %arg6[%c0_16, %c0_17] : memref<8x1xf32, #tpu.memory_space<vmem>>, vector<8x1xf32>
    tpu.vector_store %arg6[%c0_16, %c0_17], %18 {strides = array<i32>} : memref<8x1xf32, #tpu.memory_space<vmem>>, vector<8x1xf32>,
    return
  }
  func.func @transform_0(%arg0: i32, %arg1: i32) -> (i32, i32, i32) {
    %c0_i32 = arith.constant 0 : i32
    %c0_i32_0 = arith.constant 0 : i32
    %c0_i32_1 = arith.constant 0 : i32
    return %arg0, %c0_i32, %c0_i32_0 : i32, i32, i32
  }
  func.func @transform_1(%arg0: i32, %arg1: i32) -> (i32, i32, i32) {
    %c0_i32 = arith.constant 0 : i32
    %c0_i32_0 = arith.constant 0 : i32
    return %arg0, %c0_i32, %arg1 : i32, i32, i32
  }
  func.func @transform_2(%arg0: i32, %arg1: i32) -> (i32, i32) {
    %c0_i32 = arith.constant 0 : i32
    return %arg0, %arg1 : i32, i32
  }
  func.func @transform_3(%arg0: i32, %arg1: i32) -> (i32, i32) {
    %c0_i32 = arith.constant 0 : i32
    %c0_i32_0 = arith.constant 0 : i32
    return %arg0, %c0_i32 : i32, i32
  }
  func.func @transform_4(%arg0: i32, %arg1: i32) -> (i32, i32) {
    %c0_i32 = arith.constant 0 : i32
    %c0_i32_0 = arith.constant 0 : i32
    return %arg0, %c0_i32 : i32, i32
  }
}

module attributes {stable_mosaic.version = 11 : i64} {
  func.func @_matmul_stats_kernel(%arg0: i32, %arg1: i32, %arg2: memref<1x8x72xbf16, #tpu.memory_space<vmem>>, %arg3: memref<1x72x128xbf16, #tpu.memory_space<vmem>>, %arg4: memref<8x128xf32, #tpu.memory_space<vmem>>, %arg5: memref<8x1xf32, #tpu.memory_space<vmem>>, %arg6: memref<8x1xf32, #tpu.memory_space<vmem>>) attributes {dimension_semantics = [#tpu.dimension_semantics<parallel>, #tpu.dimension_semantics<arbitrary>], iteration_bounds = array<i64: 4, 1>, scalar_prefetch = 0 : i64, scratch_operands = 0 : i64, tpu.core_type = #tpu.core_type<tc>, window_params = [{transform_indices = @transform_0, window_bounds = array<i64: 1, 8, 72>}, {transform_indices = @transform_1, window_bounds = array<i64: 1, 72, 128>}, {transform_indices = @transform_2, window_bounds = array<i64: 8, 128>}, {transform_indices = @transform_3, window_bounds = array<i64: 8, 1>}, {transform_indices = @transform_4, window_bounds = array<i64: 8, 1>}]} {
    %c0_i32 = arith.constant 0 : i32
    %0 = arith.cmpi eq, %arg1, %c0_i32 : i32
    %1 = arith.extui %0 : i1 to i32
    %c0_i32_0 = arith.constant 0 : i32
    %2 = arith.cmpi ne, %1, %c0_i32_0 : i32
    scf.if %2 {
      %cst_18 = arith.constant 0.000000e+00 : f32
      %20 = vector.broadcast %cst_18 : f32 to vector<8x1xf32>
      %c0_19 = arith.constant 0 : index
      %c0_20 = arith.constant 0 : index
      %21 = vector.load %arg5[%c0_19, %c0_20] : memref<8x1xf32, #tpu.memory_space<vmem>>, vector<8x1xf32>
      tpu.vector_store %arg5[%c0_19, %c0_20], %20 {strides = array<i32>} : memref<8x1xf32, #tpu.memory_space<vmem>>, vector<8x1xf32>,
      %cst_21 = arith.constant 0.000000e+00 : f32
      %22 = vector.broadcast %cst_21 : f32 to vector<8x1xf32>
      %c0_22 = arith.constant 0 : index
      %c0_23 = arith.constant 0 : index
      %23 = vector.load %arg6[%c0_22, %c0_23] : memref<8x1xf32, #tpu.memory_space<vmem>>, vector<8x1xf32>
      tpu.vector_store %arg6[%c0_22, %c0_23], %22 {strides = array<i32>} : memref<8x1xf32, #tpu.memory_space<vmem>>, vector<8x1xf32>,
    } else {
    }
    %c0 = arith.constant 0 : index
    %c0_1 = arith.constant 0 : index
    %c0_2 = arith.constant 0 : index
    %3 = vector.load %arg2[%c0, %c0_1, %c0_2] : memref<1x8x72xbf16, #tpu.memory_space<vmem>>, vector<1x8x72xbf16>
    %4 = vector.shape_cast %3 : vector<1x8x72xbf16> to vector<8x72xbf16>
    %c0_3 = arith.constant 0 : index
    %c0_4 = arith.constant 0 : index
    %c0_5 = arith.constant 0 : index
    %5 = vector.load %arg3[%c0_3, %c0_4, %c0_5] : memref<1x72x128xbf16, #tpu.memory_space<vmem>>, vector<1x72x128xbf16>
    %6 = vector.shape_cast %5 : vector<1x72x128xbf16> to vector<72x128xbf16>
    %cst = arith.constant dense<0.000000e+00> : vector<8x128xf32>
    %7 = tpu.matmul %4, %6, %cst {dimension_numbers = #tpu.dot_dimension_numbers<[1], [0], [0], [1], [0, 0, 1, 1], [], []>} : vector<8x72xbf16>, vector<72x128xbf16>, vector<8x128xf32> -> vector<8x128xf32>
    %c0_6 = arith.constant 0 : index
    %c0_7 = arith.constant 0 : index
    %8 = vector.load %arg4[%c0_6, %c0_7] : memref<8x128xf32, #tpu.memory_space<vmem>>, vector<8x128xf32>
    tpu.vector_store %arg4[%c0_6, %c0_7], %7 {strides = array<i32>} : memref<8x128xf32, #tpu.memory_space<vmem>>, vector<8x128xf32>,
    %c0_8 = arith.constant 0 : index
    %c0_9 = arith.constant 0 : index
    %9 = vector.load %arg5[%c0_8, %c0_9] : memref<8x1xf32, #tpu.memory_space<vmem>>, vector<8x1xf32>
    %cst_10 = arith.constant dense<0.000000e+00> : vector<8xf32>
    %10 = vector.multi_reduction <add>, %7, %cst_10 [1] : vector<8x128xf32> to vector<8xf32>
    %11 = vector.shape_cast %10 : vector<8xf32> to vector<8x1xf32>
    %12 = arith.addf %9, %11 : vector<8x1xf32>
    %c0_11 = arith.constant 0 : index
    %c0_12 = arith.constant 0 : index
    %13 = vector.load %arg5[%c0_11, %c0_12] : memref<8x1xf32, #tpu.memory_space<vmem>>, vector<8x1xf32>
    tpu.vector_store %arg5[%c0_11, %c0_12], %12 {strides = array<i32>} : memref<8x1xf32, #tpu.memory_space<vmem>>, vector<8x1xf32>,
    %c0_13 = arith.constant 0 : index
    %c0_14 = arith.constant 0 : index
    %14 = vector.load %arg6[%c0_13, %c0_14] : memref<8x1xf32, #tpu.memory_space<vmem>>, vector<8x1xf32>
    %15 = arith.mulf %7, %7 : vector<8x128xf32>
    %cst_15 = arith.constant dense<0.000000e+00> : vector<8xf32>
    %16 = vector.multi_reduction <add>, %15, %cst_15 [1] : vector<8x128xf32> to vector<8xf32>
    %17 = vector.shape_cast %16 : vector<8xf32> to vector<8x1xf32>
    %18 = arith.addf %14, %17 : vector<8x1xf32>
    %c0_16 = arith.constant 0 : index
    %c0_17 = arith.constant 0 : index
    %19 = vector.load %arg6[%c0_16, %c0_17] : memref<8x1xf32, #tpu.memory_space<vmem>>, vector<8x1xf32>
    tpu.vector_store %arg6[%c0_16, %c0_17], %18 {strides = array<i32>} : memref<8x1xf32, #tpu.memory_space<vmem>>, vector<8x1xf32>,
    return
  }
  func.func @transform_0(%arg0: i32, %arg1: i32) -> (i32, i32, i32) {
    %c0_i32 = arith.constant 0 : i32
    %c0_i32_0 = arith.constant 0 : i32
    %c0_i32_1 = arith.constant 0 : i32
    return %arg0, %c0_i32, %c0_i32_0 : i32, i32, i32
  }
  func.func @transform_1(%arg0: i32, %arg1: i32) -> (i32, i32, i32) {
    %c0_i32 = arith.constant 0 : i32
    %c0_i32_0 = arith.constant 0 : i32
    return %arg0, %c0_i32, %arg1 : i32, i32, i32
  }
  func.func @transform_2(%arg0: i32, %arg1: i32) -> (i32, i32) {
    %c0_i32 = arith.constant 0 : i32
    return %arg0, %arg1 : i32, i32
  }
  func.func @transform_3(%arg0: i32, %arg1: i32) -> (i32, i32) {
    %c0_i32 = arith.constant 0 : i32
    %c0_i32_0 = arith.constant 0 : i32
    return %arg0, %c0_i32 : i32, i32
  }
  func.func @transform_4(%arg0: i32, %arg1: i32) -> (i32, i32) {
    %c0_i32 = arith.constant 0 : i32
    %c0_i32_0 = arith.constant 0 : i32
    return %arg0, %c0_i32 : i32, i32
  }
}

module attributes {stable_mosaic.version = 11 : i64} {
  func.func @_bn_relu_kernel(%arg0: i32, %arg1: memref<32x1xf32, #tpu.memory_space<vmem>>, %arg2: memref<32x1xf32, #tpu.memory_space<vmem>>, %arg3: memref<32x128xf32, #tpu.memory_space<vmem>>, %arg4: memref<32x128xf32, #tpu.memory_space<vmem>>) attributes {dimension_semantics = [#tpu.dimension_semantics<parallel>], iteration_bounds = array<i64: 1>, scalar_prefetch = 0 : i64, scratch_operands = 0 : i64, tpu.core_type = #tpu.core_type<tc>, window_params = [{pipeline_mode = #tpu.pipeline_mode<synchronous>, transform_indices = @transform_0, window_bounds = array<i64: 32, 1>}, {pipeline_mode = #tpu.pipeline_mode<synchronous>, transform_indices = @transform_1, window_bounds = array<i64: 32, 1>}, {transform_indices = @transform_2, window_bounds = array<i64: 32, 128>}, {transform_indices = @transform_3, window_bounds = array<i64: 32, 128>}]} {
    %c0 = arith.constant 0 : index
    %c0_0 = arith.constant 0 : index
    %0 = vector.load %arg3[%c0, %c0_0] : memref<32x128xf32, #tpu.memory_space<vmem>>, vector<32x128xf32>
    %c0_1 = arith.constant 0 : index
    %c0_2 = arith.constant 0 : index
    %1 = vector.load %arg1[%c0_1, %c0_2] : memref<32x1xf32, #tpu.memory_space<vmem>>, vector<32x1xf32>
    %2 = vector.broadcast %1 : vector<32x1xf32> to vector<32x128xf32>
    %3 = arith.subf %0, %2 : vector<32x128xf32>
    %c0_3 = arith.constant 0 : index
    %c0_4 = arith.constant 0 : index
    %4 = vector.load %arg2[%c0_3, %c0_4] : memref<32x1xf32, #tpu.memory_space<vmem>>, vector<32x1xf32>
    %5 = vector.broadcast %4 : vector<32x1xf32> to vector<32x128xf32>
    %6 = arith.mulf %3, %5 : vector<32x128xf32>
    %cst = arith.constant 0.000000e+00 : f32
    %7 = vector.broadcast %cst : f32 to vector<32x128xf32>
    %8 = arith.maximumf %6, %7 : vector<32x128xf32>
    %c0_5 = arith.constant 0 : index
    %c0_6 = arith.constant 0 : index
    %9 = vector.load %arg4[%c0_5, %c0_6] : memref<32x128xf32, #tpu.memory_space<vmem>>, vector<32x128xf32>
    tpu.vector_store %arg4[%c0_5, %c0_6], %8 {strides = array<i32>} : memref<32x128xf32, #tpu.memory_space<vmem>>, vector<32x128xf32>,
    return
  }
  func.func @transform_0(%arg0: i32) -> (i32, i32) {
    %c0_i32 = arith.constant 0 : i32
    %c0_i32_0 = arith.constant 0 : i32
    %c0_i32_1 = arith.constant 0 : i32
    return %c0_i32, %c0_i32_0 : i32, i32
  }
  func.func @transform_1(%arg0: i32) -> (i32, i32) {
    %c0_i32 = arith.constant 0 : i32
    %c0_i32_0 = arith.constant 0 : i32
    %c0_i32_1 = arith.constant 0 : i32
    return %c0_i32, %c0_i32_0 : i32, i32
  }
  func.func @transform_2(%arg0: i32) -> (i32, i32) {
    %c0_i32 = arith.constant 0 : i32
    %c0_i32_0 = arith.constant 0 : i32
    return %c0_i32, %arg0 : i32, i32
  }
  func.func @transform_3(%arg0: i32) -> (i32, i32) {
    %c0_i32 = arith.constant 0 : i32
    %c0_i32_0 = arith.constant 0 : i32
    return %c0_i32, %arg0 : i32, i32
  }
}

</mosaic_0001>

<bundles_post_ra>
// kernel: downsample_forward.10
= control target key start
LH: loop header
LB: loop body
LE: loop exit
PB: predicated region body
PF: predicated region fallthrough
CT: control target
= control target key end

     0   :  { %10 = vsyncpa [#allocation3], 0  ;;  %s207_s18 = smov [#allocation2]   ;;  %s295_s0 = inlined_call_operand.hbm [shape: bf16[1,8,16], index: 0, kind: input, shape index: {}]   ;;  %s296_s1 = inlined_call_operand.vmem [shape: bf16[1,16,512], index: 1, kind: input, shape index: {}]   ;;  %s297_s2 = inlined_call_operand.vmem [shape: f32[8,512], index: 2, kind: output, shape index: {0}]   ;;  %s298_s3 = inlined_call_operand.vmem [shape: f32[8,1], index: 3, kind: output, shape index: {1}]   ;;  %s299_s4 = inlined_call_operand.vmem [shape: f32[8,1], index: 4, kind: output, shape index: {2}]  }
   0x1   :  { %s16_s17 = sshll.u32 %s295_s0, 4  ;;  %s18_s19 = sshll.u32 %s207_s18, 4  ;;  %s17_s17 = int_to_ptr.hbm [resolvable:$true] %s16_s17  ;;  %s19_s19 = int_to_ptr.vmem [resolvable:$true] %s18_s19 }
   0x2   :  { %21 = dma.hbm_to_vmem [thread:$0]  %s17_s17, 64, %s19_s19, [#allocation3]  }
   0x3   :  { %205 = dma.done.wait [#allocation3], 64  }
   0x4   :  { %206 = vsyncadd [#allocation3], 4294967232  ;;  %v157_v0 = vld [vmem:[%s296_s1] sm:$0xf]  ;;  %v177_v1 = vld [vmem:[%s296_s1 + $0xc] sm:$0xf0] }
   0x5   :  { %v175_v2 = vld [vmem:[%s296_s1 + $0x4] sm:$0xf]  ;;  %v158_v3 = vor.u32 %v177_v1, %v157_v0  ;;  %v159_v4 = vld [vmem:[%s296_s1 + $0x10] sm:$0xf0]  ;;  %v165_v5 = vld [vmem:[%s296_s1 + $0x8] sm:$0xf] }
   0x6   :  { %v178_v6 = vld [vmem:[%s296_s1 + $0x14] sm:$0xf0]  ;;  %v162_v7 = vor.u32 %v175_v2, %v159_v4  ;;  %v176_v9 = vld [vmem:[%s296_s1 + $0xc] sm:$0xf]  ;;  %v167_v10 = vld [vmem:[%s296_s1 + $0x18] sm:$0xf0] }
   0x7   :  { %v166_v8 = vor.u32 %v178_v6, %v165_v5  ;;  %72 = vmatpush.bf16.msra.mxu0 %v158_v3  ;;  %v170_v11 = vor.u32 %v176_v9, %v167_v10  ;;  %v36_v12 = vld [vmem:[#allocation2] sm:$0xf]  ;;  %vm61_vm0 = vcmask 130048   ;;  %vm33_vm1 = vcmask 7168  }
   0x8   :  { %85 = vmatpush.bf16.msra.mxu1 %v162_v7  ;;  %v208_v13 = vmov 0.0  }
   0x9   :  { %98 = vmatpush.bf16.msra.mxu2 %v166_v8  ;;  %111 = vmatpush.bf16.msra.mxu3 %v170_v11  ;;  %34 = vst.msk [vmem:[%s298_s3] sm:$0xff] %vm33_vm1, %v208_v13 }
   0xa   :  { %171 = vmatmul.msk.bf16.vlgmr.msra.gmra.mxu0 %vm61_vm0, %v36_v12  ;;  %35 = vst.msk [vmem:[%s299_s4] sm:$0xff] %vm33_vm1, %v208_v13 }
   0xb   :  { %172 = vmatmul.msk.bf16.vlgmr.msra.gmra.mxu1 %vm61_vm0, %v36_v12 }
   0xc   :  { %173 = vmatmul.msk.bf16.vlgmr.msra.gmra.mxu2 %vm61_vm0, %v36_v12  ;;  %174 = vmatmul.msk.bf16.vlgmr.msra.gmra.mxu3 %vm61_vm0, %v36_v12 }
  0x10   :  { %v121_v32 = vld [vmem:[%s298_s3] sm:$0xff] }
  0x11   :  { %v130_v35 = vld [vmem:[%s299_s4] sm:$0xff] }
  0x87   :  { %v74_v14 = vpop.f32.mrf.mxu0 }
  0x88   :  { %117 = vst [vmem:[%s297_s2] sm:$0xff] %v74_v14  ;;  %v87_v15 = vpop.f32.mrf.mxu1  ;;  %v131_v17 = vmul.f32 %v74_v14, %v74_v14 }
  0x89   :  { %118 = vst [vmem:[%s297_s2 + $0x8] sm:$0xff] %v87_v15  ;;  %v122_v16 = vadd.f32 %v87_v15, %v74_v14  ;;  %v132_v18 = vmul.f32 %v87_v15, %v87_v15 }
  0x8b   :  { %v135_v26 = vadd.f32 %v132_v18, %v131_v17 }
  0x8f   :  { %v100_v19 = vpop.f32.mrf.mxu2  ;;  %v113_v20 = vpop.f32.mrf.mxu3 }
  0x90   :  { %119 = vst [vmem:[%s297_s2 + $0x10] sm:$0xff] %v100_v19  ;;  %v76_v21 = vpop.f32.mrf.mxu0  ;;  %v123_v22 = vadd.f32 %v122_v16, %v100_v19  ;;  %v89_v23 = vpop.f32.mrf.mxu1  ;;  %v133_v24 = vmul.f32 %v100_v19, %v100_v19  ;;  %v134_v27 = vmul.f32 %v113_v20, %v113_v20 }
  0x91   :  { %120 = vst [vmem:[%s297_s2 + $0x18] sm:$0xff] %v113_v20 }
  0x92   :  { %v124_v25 = vadd.f32 %v123_v22, %v113_v20  ;;  %v136_v28 = vadd.f32 %v135_v26, %v133_v24 }
  0x94   :  { %125 = vadd.xlane.f32.xlu0 %v124_v25  ;;  %v137_v31 = vadd.f32 %v136_v28, %v134_v27 }
  0x97   :  { %v102_v29 = vpop.f32.mrf.mxu2  ;;  %v115_v30 = vpop.f32.mrf.mxu3 }
  0x9c   :  { %138 = vadd.xlane.f32.xlu0 %v137_v31 }
 0x107   :  { %v126_v33 = vpop.xlane.xlu0 %125 }
 0x108   :  { %v127_v34 = vadd.f32 %v126_v33, %v121_v32 }
 0x10a   :  { %129 = vst.msk [vmem:[%s298_s3] sm:$0xff] %vm33_vm1, %v127_v34 }
 0x10f   :  { %v139_v36 = vpop.xlane.xlu0 %138 }
 0x110   :  { %v140_v37 = vadd.f32 %v139_v36, %v130_v35 }
 0x112   :  { %141 = vst.msk [vmem:[%s299_s4] sm:$0xff] %vm33_vm1, %v140_v37 }
 0x113   :  { %154 = vsyncpa [#allocation3], 1 }

// kernel: downsample_forward.11
= control target key start
LH: loop header
LB: loop body
LE: loop exit
PB: predicated region body
PF: predicated region fallthrough
CT: control target
= control target key end

     0   :  { %v52_v0 = vmov 0   ;;  %s103_s0 = inlined_call_operand.vmem [shape: f32[8,1], index: 0, kind: input, shape index: {}]   ;;  %s104_s1 = inlined_call_operand.vmem [shape: f32[8,1], index: 1, kind: input, shape index: {}]   ;;  %s105_s2 = inlined_call_operand.vmem [shape: f32[8,512], index: 2, kind: input, shape index: {}]   ;;  %s106_s3 = inlined_call_operand.vmem [shape: f32[8,512], index: 3, kind: output, shape index: {}]  }
   0x1   :  { %51 = vset.pattern.permute.xlu0 %v52_v0  ;;  %v18_v1 = vld [vmem:[%s103_s0] sm:$0xff]  ;;  %v15_v5 = vld [vmem:[%s105_s2 + $0x8] sm:$0xff]  ;;  %v16_v6 = vld [vmem:[%s105_s2 + $0x10] sm:$0xff] }
   0x2   :  { %21 = vperm.xlu0 %51, %v18_v1   ;;  %v28_v2 = vld [vmem:[%s104_s1] sm:$0xff]  ;;  %v17_v7 = vld [vmem:[%s105_s2 + $0x18] sm:$0xff] }
   0x3   :  { %v14_v4 = vld [vmem:[%s105_s2] sm:$0xff] }
   0xa   :  { %31 = vperm.xlu0 %51, %v28_v2  }
  0x74   :  { %v22_v3 = vpop.permute.xlu0 %21 }
  0x75   :  { %v24_v8 = vsub.f32 %v14_v4, %v22_v3  ;;  %v25_v9 = vsub.f32 %v15_v5, %v22_v3  ;;  %v26_v10 = vsub.f32 %v16_v6, %v22_v3  ;;  %v27_v11 = vsub.f32 %v17_v7, %v22_v3 }
  0x7c   :  { %v32_v12 = vpop.permute.xlu0 %31 }
  0x7d   :  { %v34_v13 = vmul.f32 %v32_v12, %v24_v8  ;;  %v35_v14 = vmul.f32 %v32_v12, %v25_v9  ;;  %v36_v15 = vmul.f32 %v32_v12, %v26_v10  ;;  %v37_v16 = vmul.f32 %v32_v12, %v27_v11 }
  0x7f   :  { %v38_v17 = vmax.f32 %v34_v13, 0.0  ;;  %v39_v18 = vmax.f32 %v35_v14, 0.0  ;;  %v40_v19 = vmax.f32 %v36_v15, 0.0  ;;  %v41_v20 = vmax.f32 %v37_v16, 0.0 }
  0x81   :  { %42 = vst [vmem:[%s106_s3] sm:$0xff] %v38_v17 }
  0x82   :  { %43 = vst [vmem:[%s106_s3 + $0x8] sm:$0xff] %v39_v18 }
  0x83   :  { %44 = vst [vmem:[%s106_s3 + $0x10] sm:$0xff] %v40_v19 }
  0x84   :  { %45 = vst [vmem:[%s106_s3 + $0x18] sm:$0xff] %v41_v20 }

// kernel: downsample_forward.12
= control target key start
LH: loop header
LB: loop body
LE: loop exit
PB: predicated region body
PF: predicated region fallthrough
CT: control target
= control target key end

     0   :  { %vm135_vm0 = vcmask 1043456   ;;  %vm131_vm1 = vcmask 588800   ;;  %vm19_vm2 = vcmask 7168   ;;  %v322_v63 = vmov 0.0   ;;  %s491_s1 = inlined_call_operand.vmem [shape: bf16[1,72,512], index: 1, kind: input, shape index: {}]   ;;  %s492_s0 = inlined_call_operand.vmem [shape: bf16[1,8,72], index: 0, kind: input, shape index: {}]   ;;  %s493_s3 = inlined_call_operand.vmem [shape: f32[8,1], index: 3, kind: output, shape index: {1}]   ;;  %s494_s2 = inlined_call_operand.vmem [shape: f32[8,512], index: 2, kind: output, shape index: {0}]   ;;  %s495_s4 = inlined_call_operand.vmem [shape: f32[8,1], index: 4, kind: output, shape index: {2}]  }
   0x1   :  { %v39_v0 = vld [vmem:[%s491_s1 + $0x80] sm:$0xff]  ;;  %v40_v1 = vld [vmem:[%s491_s1 + $0x88] sm:$0xff]  ;;  %v319_v7 = vld [vmem:[%s491_s1 + $0x6c] sm:$0xf0]  ;;  %20 = vst.msk [vmem:[%s493_s3] sm:$0xff] %vm19_vm2, %v322_v63 }
   0x2   :  { %v91_v2 = vunpack.c.l.b16 %v39_v0  ;;  %v92_v3 = vunpack.c.h.b16 %v39_v0  ;;  %v93_v4 = vunpack.c.l.b16 %v40_v1  ;;  %v94_v5 = vunpack.c.h.b16 %v40_v1  ;;  %v287_v6 = vld [vmem:[%s491_s1 + $0x60] sm:$0xf]  ;;  %v317_v12 = vld [vmem:[%s491_s1 + $0x64] sm:$0xf]  ;;  %v289_v13 = vld [vmem:[%s491_s1 + $0x70] sm:$0xf0] }
   0x3   :  { %v295_v14 = vld [vmem:[%s491_s1 + $0x68] sm:$0xf]  ;;  %v320_v15 = vld [vmem:[%s491_s1 + $0x74] sm:$0xf0]  ;;  %v318_v16 = vld [vmem:[%s491_s1 + $0x6c] sm:$0xf]  ;;  %v288_v22 = vor.u32 %v319_v7, %v287_v6  ;;  %v292_v23 = vor.u32 %v317_v12, %v289_v13 }
   0x4   :  { %v111_v8 = vpack.c.b16 %v91_v2, %v91_v2  ;;  %v112_v9 = vpack.c.b16 %v92_v3, %v92_v3  ;;  %v113_v10 = vpack.c.b16 %v93_v4, %v93_v4  ;;  %v114_v11 = vpack.c.b16 %v94_v5, %v94_v5  ;;  %v297_v17 = vld [vmem:[%s491_s1 + $0x78] sm:$0xf0]  ;;  %v271_v24 = vld [vmem:[%s491_s1 + $0x40] sm:$0xf]  ;;  %v315_v25 = vld [vmem:[%s491_s1 + $0x4c] sm:$0xf0] }
   0x5   :  { %v296_v26 = vor.u32 %v320_v15, %v295_v14  ;;  %v300_v27 = vor.u32 %v318_v16, %v297_v17  ;;  %v313_v28 = vld [vmem:[%s491_s1 + $0x44] sm:$0xf]  ;;  %v273_v29 = vld [vmem:[%s491_s1 + $0x50] sm:$0xf0]  ;;  %v279_v30 = vld [vmem:[%s491_s1 + $0x48] sm:$0xf]  ;;  %v272_v34 = vor.u32 %v315_v25, %v271_v24 }
   0x6   :  { %v137_v18 = vsel %vm135_vm0, %v111_v8, 0  ;;  %v140_v19 = vsel %vm135_vm0, %v112_v9, 0  ;;  %v143_v20 = vsel %vm135_vm0, %v113_v10, 0  ;;  %v146_v21 = vsel %vm135_vm0, %v114_v11, 0  ;;  %v316_v31 = vld [vmem:[%s491_s1 + $0x54] sm:$0xf0] }
   0x7   :  { %151 = vmatpush.bf16.msra.mxu0 %v137_v18  ;;  %164 = vmatpush.bf16.msra.mxu1 %v140_v19  ;;  %v314_v32 = vld [vmem:[%s491_s1 + $0x4c] sm:$0xf]  ;;  %v281_v33 = vld [vmem:[%s491_s1 + $0x58] sm:$0xf0]  ;;  %v276_v35 = vor.u32 %v313_v28, %v273_v29  ;;  %v255_v36 = vld [vmem:[%s491_s1 + $0x20] sm:$0xf]  ;;  %v280_v38 = vor.u32 %v316_v31, %v279_v30 }
   0x8   :  { %177 = vmatpush.bf16.msra.mxu2 %v143_v20  ;;  %190 = vmatpush.bf16.msra.mxu3 %v146_v21  ;;  %v311_v37 = vld [vmem:[%s491_s1 + $0x2c] sm:$0xf0]  ;;  %v284_v39 = vor.u32 %v314_v32, %v281_v33  ;;  %v309_v40 = vld [vmem:[%s491_s1 + $0x24] sm:$0xf]  ;;  %v257_v41 = vld [vmem:[%s491_s1 + $0x30] sm:$0xf0] }
   0x9   :  { %v263_v42 = vld [vmem:[%s491_s1 + $0x28] sm:$0xf]  ;;  %v312_v43 = vld [vmem:[%s491_s1 + $0x34] sm:$0xf0]  ;;  %v310_v44 = vld [vmem:[%s491_s1 + $0x2c] sm:$0xf]  ;;  %v256_v46 = vor.u32 %v311_v37, %v255_v36  ;;  %v260_v47 = vor.u32 %v309_v40, %v257_v41 }
   0xa   :  { %v265_v45 = vld [vmem:[%s491_s1 + $0x38] sm:$0xf0]  ;;  %v239_v48 = vld [vmem:[%s491_s1] sm:$0xf]  ;;  %v307_v49 = vld [vmem:[%s491_s1 + $0xc] sm:$0xf0]  ;;  %v264_v50 = vor.u32 %v312_v43, %v263_v42 }
   0xb   :  { %152 = vmatpush.bf16.msra.mxu0 %v288_v22  ;;  %165 = vmatpush.bf16.msra.mxu1 %v292_v23  ;;  %v268_v51 = vor.u32 %v310_v44, %v265_v45  ;;  %v305_v52 = vld [vmem:[%s491_s1 + $0x4] sm:$0xf]  ;;  %v241_v53 = vld [vmem:[%s491_s1 + $0x10] sm:$0xf0]  ;;  %v247_v54 = vld [vmem:[%s491_s1 + $0x8] sm:$0xf]  ;;  %v240_v58 = vor.u32 %v307_v49, %v239_v48 }
   0xc   :  { %178 = vmatpush.bf16.msra.mxu2 %v296_v26  ;;  %191 = vmatpush.bf16.msra.mxu3 %v300_v27  ;;  %v308_v55 = vld [vmem:[%s491_s1 + $0x14] sm:$0xf0]  ;;  %v306_v56 = vld [vmem:[%s491_s1 + $0xc] sm:$0xf]  ;;  %v249_v57 = vld [vmem:[%s491_s1 + $0x18] sm:$0xf0]  ;;  %v244_v59 = vor.u32 %v305_v52, %v241_v53 }
   0xd   :  { %v248_v60 = vor.u32 %v308_v55, %v247_v54  ;;  %v252_v61 = vor.u32 %v306_v56, %v249_v57  ;;  %v22_v62 = vld [vmem:[%s492_s0] sm:$0xf]  ;;  %21 = vst.msk [vmem:[%s495_s4] sm:$0xff] %vm19_vm2, %v322_v63 }
   0xe   :  { %v204_v18 = vld [vmem:[%s493_s3] sm:$0xff] }
   0xf   :  { %153 = vmatpush.bf16.msra.mxu0 %v272_v34  ;;  %166 = vmatpush.bf16.msra.mxu1 %v276_v35 }
  0x10   :  { %179 = vmatpush.bf16.msra.mxu2 %v280_v38  ;;  %192 = vmatpush.bf16.msra.mxu3 %v284_v39 }
  0x13   :  { %154 = vmatpush.bf16.msra.mxu0 %v256_v46  ;;  %167 = vmatpush.bf16.msra.mxu1 %v260_v47 }
  0x14   :  { %180 = vmatpush.bf16.msra.mxu2 %v264_v50  ;;  %193 = vmatpush.bf16.msra.mxu3 %v268_v51  ;;  %v213_v21 = vld [vmem:[%s495_s4] sm:$0xff] }
  0x17   :  { %155 = vmatpush.bf16.msra.mxu0 %v240_v58  ;;  %168 = vmatpush.bf16.msra.mxu1 %v244_v59 }
  0x18   :  { %181 = vmatpush.bf16.msra.mxu2 %v248_v60  ;;  %194 = vmatpush.bf16.msra.mxu3 %v252_v61 }
  0x1a   :  { %301 = vmatmul.msk.bf16.vlgmr.msra.gmra.mxu0 %vm131_vm1, %v22_v62  ;;  %302 = vmatmul.msk.bf16.vlgmr.msra.gmra.mxu1 %vm131_vm1, %v22_v62 }
  0x1b   :  { %303 = vmatmul.msk.bf16.vlgmr.msra.gmra.mxu2 %vm131_vm1, %v22_v62  ;;  %304 = vmatmul.msk.bf16.vlgmr.msra.gmra.mxu3 %vm131_vm1, %v22_v62 }
  0x97   :  { %v157_v0 = vpop.f32.mrf.mxu0  ;;  %v170_v1 = vpop.f32.mrf.mxu1 }
  0x98   :  { %200 = vst [vmem:[%s494_s2] sm:$0xff] %v157_v0  ;;  %v205_v2 = vadd.f32 %v170_v1, %v157_v0  ;;  %v214_v3 = vmul.f32 %v157_v0, %v157_v0  ;;  %v215_v4 = vmul.f32 %v170_v1, %v170_v1 }
  0x99   :  { %201 = vst [vmem:[%s494_s2 + $0x8] sm:$0xff] %v170_v1 }
  0x9a   :  { %v218_v12 = vadd.f32 %v215_v4, %v214_v3 }
  0x9e   :  { %v183_v5 = vpop.f32.mrf.mxu2  ;;  %v196_v6 = vpop.f32.mrf.mxu3 }
  0x9f   :  { %202 = vst [vmem:[%s494_s2 + $0x10] sm:$0xff] %v183_v5  ;;  %v159_v7 = vpop.f32.mrf.mxu0  ;;  %v172_v8 = vpop.f32.mrf.mxu1  ;;  %v206_v9 = vadd.f32 %v205_v2, %v183_v5  ;;  %v216_v10 = vmul.f32 %v183_v5, %v183_v5  ;;  %v217_v13 = vmul.f32 %v196_v6, %v196_v6 }
  0xa0   :  { %203 = vst [vmem:[%s494_s2 + $0x18] sm:$0xff] %v196_v6 }
  0xa1   :  { %v207_v11 = vadd.f32 %v206_v9, %v196_v6  ;;  %v219_v14 = vadd.f32 %v218_v12, %v216_v10 }
  0xa3   :  { %208 = vadd.xlane.f32.xlu0 %v207_v11  ;;  %v220_v17 = vadd.f32 %v219_v14, %v217_v13 }
  0xa6   :  { %v185_v15 = vpop.f32.mrf.mxu2  ;;  %v198_v16 = vpop.f32.mrf.mxu3 }
  0xab   :  { %221 = vadd.xlane.f32.xlu0 %v220_v17 }
 0x116   :  { %v209_v19 = vpop.xlane.xlu0 %208 }
 0x117   :  { %v210_v20 = vadd.f32 %v209_v19, %v204_v18 }
 0x119   :  { %212 = vst.msk [vmem:[%s493_s3] sm:$0xff] %vm19_vm2, %v210_v20 }
 0x11e   :  { %v222_v22 = vpop.xlane.xlu0 %221 }
 0x11f   :  { %v223_v23 = vadd.f32 %v222_v22, %v213_v21 }
 0x121   :  { %224 = vst.msk [vmem:[%s495_s4] sm:$0xff] %vm19_vm2, %v223_v23 }

// kernel: downsample_forward.14
= control target key start
LH: loop header
LB: loop body
LE: loop exit
PB: predicated region body
PF: predicated region fallthrough
CT: control target
= control target key end

     0   :  { %vm47_vm0 = vcmask 130048   ;;  %vm19_vm1 = vcmask 7168   ;;  %v165_v13 = vmov 0.0   ;;  %s252_s1 = inlined_call_operand.vmem [shape: bf16[1,16,512], index: 1, kind: input, shape index: {}]   ;;  %s253_s0 = inlined_call_operand.vmem [shape: bf16[1,8,16], index: 0, kind: input, shape index: {}]   ;;  %s254_s3 = inlined_call_operand.vmem [shape: f32[8,1], index: 3, kind: output, shape index: {1}]   ;;  %s255_s2 = inlined_call_operand.vmem [shape: f32[8,512], index: 2, kind: output, shape index: {0}]   ;;  %s256_s4 = inlined_call_operand.vmem [shape: f32[8,1], index: 4, kind: output, shape index: {2}]  }
   0x1   :  { %v142_v0 = vld [vmem:[%s252_s1] sm:$0xf]  ;;  %v162_v1 = vld [vmem:[%s252_s1 + $0xc] sm:$0xf0]  ;;  %v160_v2 = vld [vmem:[%s252_s1 + $0x4] sm:$0xf] }
   0x2   :  { %v143_v3 = vor.u32 %v162_v1, %v142_v0  ;;  %v144_v4 = vld [vmem:[%s252_s1 + $0x10] sm:$0xf0]  ;;  %v150_v5 = vld [vmem:[%s252_s1 + $0x8] sm:$0xf]  ;;  %v163_v6 = vld [vmem:[%s252_s1 + $0x14] sm:$0xf0] }
   0x3   :  { %v147_v7 = vor.u32 %v160_v2, %v144_v4  ;;  %v151_v8 = vor.u32 %v163_v6, %v150_v5  ;;  %v161_v9 = vld [vmem:[%s252_s1 + $0xc] sm:$0xf]  ;;  %v152_v10 = vld [vmem:[%s252_s1 + $0x18] sm:$0xf0]  ;;  %v22_v12 = vld [vmem:[%s253_s0] sm:$0xf] }
   0x4   :  { %58 = vmatpush.bf16.msra.mxu0 %v143_v3  ;;  %v155_v11 = vor.u32 %v161_v9, %v152_v10  ;;  %20 = vst.msk [vmem:[%s254_s3] sm:$0xff] %vm19_vm1, %v165_v13 }
   0x5   :  { %71 = vmatpush.bf16.msra.mxu1 %v147_v7  ;;  %84 = vmatpush.bf16.msra.mxu2 %v151_v8  ;;  %21 = vst.msk [vmem:[%s256_s4] sm:$0xff] %vm19_vm1, %v165_v13 }
   0x6   :  { %97 = vmatpush.bf16.msra.mxu3 %v155_v11 }
   0x7   :  { %156 = vmatmul.msk.bf16.vlgmr.msra.gmra.mxu0 %vm47_vm0, %v22_v12 }
   0x8   :  { %157 = vmatmul.msk.bf16.vlgmr.msra.gmra.mxu1 %vm47_vm0, %v22_v12  ;;  %158 = vmatmul.msk.bf16.vlgmr.msra.gmra.mxu2 %vm47_vm0, %v22_v12 }
   0x9   :  { %159 = vmatmul.msk.bf16.vlgmr.msra.gmra.mxu3 %vm47_vm0, %v22_v12 }
   0xb   :  { %v107_v32 = vld [vmem:[%s254_s3] sm:$0xff] }
   0xc   :  { %v116_v35 = vld [vmem:[%s256_s4] sm:$0xff] }
  0x84   :  { %v60_v14 = vpop.f32.mrf.mxu0 }
  0x85   :  { %103 = vst [vmem:[%s255_s2] sm:$0xff] %v60_v14  ;;  %v73_v15 = vpop.f32.mrf.mxu1  ;;  %v117_v17 = vmul.f32 %v60_v14, %v60_v14 }
  0x86   :  { %104 = vst [vmem:[%s255_s2 + $0x8] sm:$0xff] %v73_v15  ;;  %v108_v16 = vadd.f32 %v73_v15, %v60_v14  ;;  %v118_v18 = vmul.f32 %v73_v15, %v73_v15 }
  0x88   :  { %v121_v26 = vadd.f32 %v118_v18, %v117_v17 }
  0x8b   :  { %v86_v19 = vpop.f32.mrf.mxu2 }
  0x8c   :  { %105 = vst [vmem:[%s255_s2 + $0x10] sm:$0xff] %v86_v19  ;;  %v99_v20 = vpop.f32.mrf.mxu3  ;;  %v62_v21 = vpop.f32.mrf.mxu0  ;;  %v109_v22 = vadd.f32 %v108_v16, %v86_v19  ;;  %v119_v24 = vmul.f32 %v86_v19, %v86_v19 }
  0x8d   :  { %106 = vst [vmem:[%s255_s2 + $0x18] sm:$0xff] %v99_v20  ;;  %v75_v23 = vpop.f32.mrf.mxu1  ;;  %v120_v27 = vmul.f32 %v99_v20, %v99_v20 }
  0x8e   :  { %v110_v25 = vadd.f32 %v109_v22, %v99_v20  ;;  %v122_v28 = vadd.f32 %v121_v26, %v119_v24 }
  0x90   :  { %111 = vadd.xlane.f32.xlu0 %v110_v25  ;;  %v123_v31 = vadd.f32 %v122_v28, %v120_v27 }
  0x93   :  { %v88_v29 = vpop.f32.mrf.mxu2 }
  0x94   :  { %v101_v30 = vpop.f32.mrf.mxu3 }
  0x98   :  { %124 = vadd.xlane.f32.xlu0 %v123_v31 }
 0x103   :  { %v112_v33 = vpop.xlane.xlu0 %111 }
 0x104   :  { %v113_v34 = vadd.f32 %v112_v33, %v107_v32 }
 0x106   :  { %115 = vst.msk [vmem:[%s254_s3] sm:$0xff] %vm19_vm1, %v113_v34 }
 0x10b   :  { %v125_v36 = vpop.xlane.xlu0 %124 }
 0x10c   :  { %v126_v37 = vadd.f32 %v125_v36, %v116_v35 }
 0x10e   :  { %127 = vst.msk [vmem:[%s256_s4] sm:$0xff] %vm19_vm1, %v126_v37 }

// kernel: downsample_forward.18
= control target key start
LH: loop header
LB: loop body
LE: loop exit
PB: predicated region body
PF: predicated region fallthrough
CT: control target
= control target key end

     0   :  { %s604_s15 = smov 0   ;;  %s606_s16 = smov 0   ;;  %s650_s0 = inlined_call_operand.vmem [shape: bf16[4,8,72], index: 0, kind: input, shape index: {}]   ;;  %s651_s1 = inlined_call_operand.vmem [shape: bf16[4,72,128], index: 1, kind: input, shape index: {}]   ;;  %s652_s2 = inlined_call_operand.vmem [shape: f32[32,128], index: 2, kind: output, shape index: {0}]   ;;  %s653_s3 = inlined_call_operand.vmem [shape: f32[32,1], index: 3, kind: output, shape index: {1}]   ;;  %s654_s4 = inlined_call_operand.vmem [shape: f32[32,1], index: 4, kind: output, shape index: {2}]  }
   0x1   :  { %s608_s17 = smov 0  }
   0x2 LB: > { %s27_s18 = sadd.s32 1, %s572_s16  ;;  %p499_p0 = scmp.ge.s32.totalorder %s576_s17, 1  ;;  %s576_s17 = sphi %s608_s17, %s15_s17   ;;  %s572_s16 = sphi %s606_s16, %s656_s16   ;;  %s568_s15 = sphi %s604_s15, %s655_s15  }
   0x3   : > { %p29_p1 = scmp.ge.s32.totalorder %s27_s18, 4  ;;  %p195_p2 = scmp.lt.s32.totalorder %s576_s17, 5 }
   0x5   : > { %s658_s18 = smov (%p29_p1, %s27_s18), 0  ;;  %p196_p3 = pnand %p499_p0, %p195_p2 }
   0x6   : > { %p238_p4 = scmp.lt.s32.totalorder (!%p196_p3), %s568_s15, 3 }
   0x7   : > { %199 = sbr.rel (%p196_p3) target bundleno = 294 (0x126), region = 28 }
   0xc   : > { %s660_s15 = smov (!%p238_p4, %s568_s15), 3  ;;  %vm314_vm0 = vcmask 1043456   ;;  %vm310_vm1 = vcmask 588800   ;;  %vm270_vm2 = vcmask 7168   ;;  %v578_v9 = vmov 0.0  }
   0xd   : > { %s528_s19 = smul.u32 36, %s660_s15  ;;  %s500_s23 = sshll.u32 %s660_s15, 2 }
   0xe   : > { %s241_s26 = scalar_lea.vmem %s650_s0, %s500_s23  ;;  %s502_s27 = sshll.u32 %s660_s15, 3 }
   0xf   : > { %s249_s22 = scalar_lea.vmem %s651_s1, %s528_s19  ;;  %v273_v8 = vld [vmem:[%s241_s26] sm:$0xf]  ;;  %s260_s30 = scalar_lea.vmem %s653_s3, %s502_s27 }
  0x10   : > { %v282_v0 = vld [vmem:[%s249_s22 + $0x20] sm:$0xf]  ;;  %v527_v4 = vld [vmem:[%s249_s22 + $0x18] sm:$0xff]  ;;  %v526_v5 = vld [vmem:[%s249_s22 + $0x10] sm:$0xff]  ;;  %271 = vst.msk [vmem:[%s260_s30] sm:$0xff] %vm270_vm2, %v578_v9  ;;  %s264_s7 = scalar_lea.vmem %s654_s4, %s502_s27  ;;  %s256_s10 = scalar_lea.vmem %s652_s2, %s502_s27 }
  0x11   : > { %v300_v1 = vunpack.c.l.b16 %v282_v0  ;;  %v525_v6 = vld [vmem:[%s249_s22 + $0x8] sm:$0xff]  ;;  %v524_v7 = vld [vmem:[%s249_s22] sm:$0xff]  ;;  %272 = vst.msk [vmem:[%s264_s7] sm:$0xff] %vm270_vm2, %v578_v9 }
  0x13   : > { %v305_v2 = vpack.c.b16 %v300_v1, %v300_v1 }
  0x15   : > { %v316_v3 = vsel %vm314_vm0, %v305_v2, 0 }
  0x16   : > { %321 = vmatpush.bf16.msra.mxu0 %v316_v3 }
  0x17   : > { %v332_v13 = vld [vmem:[%s260_s30] sm:$0xff] }
  0x18   : > { %v338_v16 = vld [vmem:[%s264_s7] sm:$0xff] }
  0x1a   : > { %322 = vmatpush.bf16.msra.mxu0 %v527_v4 }
  0x1e   : > { %323 = vmatpush.bf16.msra.mxu0 %v526_v5 }
  0x22   : > { %324 = vmatpush.bf16.msra.mxu0 %v525_v6 }
  0x26   : > { %325 = vmatpush.bf16.msra.mxu0 %v524_v7 }
  0x29   : > { %521 = vmatmul.msk.bf16.vlgmr.msra.gmra.mxu0 %vm310_vm1, %v273_v8 }
  0xa6   : > { %v327_v10 = vpop.f32.mrf.mxu0 }
  0xa7   : > { %331 = vst [vmem:[%s256_s10] sm:$0xff] %v327_v10  ;;  %333 = vadd.xlane.f32.xlu0 %v327_v10  ;;  %v339_v11 = vmul.f32 %v327_v10, %v327_v10 }
  0xae   : > { %v329_v12 = vpop.f32.mrf.mxu0 }
  0xaf   : > { %340 = vadd.xlane.f32.xlu0 %v339_v11 }
 0x11a   : > { %v334_v14 = vpop.xlane.xlu0 %333 }
 0x11b   : > { %v335_v15 = vadd.f32 %v334_v14, %v332_v13 }
 0x11d   : > { %337 = vst.msk [vmem:[%s260_s30] sm:$0xff] %vm270_vm2, %v335_v15 }
 0x122   : > { %v341_v17 = vpop.xlane.xlu0 %340 }
 0x123   : > { %v342_v18 = vadd.f32 %v341_v17, %v338_v16 }
 0x125   : > { %343 = vst.msk [vmem:[%s264_s7] sm:$0xff] %vm270_vm2, %v342_v18 }
 0x126 PF: > { %s15_s17 = sadd.s32 1, %s576_s17   ;;  %s655_s15 = smov %s572_s16 }
 0x127   : > { %p12_p5 = scmp.ge.s32.totalorder %s15_s17, 6   ;;  %s656_s16 = smov %s658_s18 }
 0x129   :  { %14 = sbr.rel (!%p12_p5) target bundleno = 2 (0x2), region = 89 }

// kernel: downsample_forward.19
= control target key start
LH: loop header
LB: loop body
LE: loop exit
PB: predicated region body
PF: predicated region fallthrough
CT: control target
= control target key end

     0   :  { %v90_v0 = vmov 0   ;;  %s159_s0 = inlined_call_operand.vmem [shape: f32[32,1], index: 0, kind: input, shape index: {}]   ;;  %s160_s1 = inlined_call_operand.vmem [shape: f32[32,1], index: 1, kind: input, shape index: {}]   ;;  %s161_s2 = inlined_call_operand.vmem [shape: f32[32,128], index: 2, kind: input, shape index: {}]   ;;  %s162_s3 = inlined_call_operand.vmem [shape: f32[32,128], index: 3, kind: output, shape index: {}]  }
   0x1   :  { %88 = vset.pattern.permute.xlu1 %v90_v0  ;;  %87 = vset.pattern.permute.xlu0 %v90_v0  ;;  %v20_v1 = vld [vmem:[%s159_s0 + $0x10] sm:$0xff]  ;;  %v18_v2 = vld [vmem:[%s159_s0] sm:$0xff]  ;;  %v21_v4 = vld [vmem:[%s159_s0 + $0x18] sm:$0xff] }
   0x2   :  { %34 = vperm.xlu1 %88, %v20_v1   ;;  %24 = vperm.xlu0 %87, %v18_v2   ;;  %v46_v3 = vld [vmem:[%s160_s1] sm:$0xff]  ;;  %v19_v5 = vld [vmem:[%s159_s0 + $0x8] sm:$0xff]  ;;  %v49_v7 = vld [vmem:[%s160_s1 + $0x18] sm:$0xff] }
   0x3   :  { %89 = vset.pattern.permute.xlu2 %v90_v0  ;;  %v47_v6 = vld [vmem:[%s160_s1 + $0x8] sm:$0xff]  ;;  %v48_v8 = vld [vmem:[%s160_s1 + $0x10] sm:$0xff]  ;;  %v14_v9 = vld [vmem:[%s161_s2] sm:$0xff] }
   0x4   :  { %52 = vperm.xlu2 %89, %v46_v3   ;;  %v15_v16 = vld [vmem:[%s161_s2 + $0x8] sm:$0xff]  ;;  %v16_v22 = vld [vmem:[%s161_s2 + $0x10] sm:$0xff]  ;;  %v17_v23 = vld [vmem:[%s161_s2 + $0x18] sm:$0xff] }
   0xa   :  { %39 = vperm.xlu1 %88, %v21_v4   ;;  %29 = vperm.xlu0 %87, %v19_v5  }
   0xc   :  { %57 = vperm.xlu2 %89, %v47_v6  }
  0x12   :  { %67 = vperm.xlu1 %88, %v49_v7   ;;  %62 = vperm.xlu0 %87, %v48_v8  }
  0x5e   :  { %v53_v10 = vpop.permute.xlu2 %52 }
  0x66   :  { %v58_v20 = vpop.permute.xlu2 %57 }
  0x74   :  { %v35_v11 = vpop.permute.xlu1 %34  ;;  %v25_v12 = vpop.permute.xlu0 %24 }
  0x75   :  { %v42_v13 = vsub.f32 %v14_v9, %v25_v12  ;;  %v44_v25 = vsub.f32 %v16_v22, %v35_v11 }
  0x77   :  { %v70_v14 = vmul.f32 %v53_v10, %v42_v13 }
  0x79   :  { %v74_v15 = vmax.f32 %v70_v14, 0.0 }
  0x7b   :  { %78 = vst [vmem:[%s162_s3] sm:$0xff] %v74_v15 }
  0x7c   :  { %v40_v17 = vpop.permute.xlu1 %39  ;;  %v30_v18 = vpop.permute.xlu0 %29 }
  0x7d   :  { %v43_v19 = vsub.f32 %v15_v16, %v30_v18  ;;  %v45_v26 = vsub.f32 %v17_v23, %v40_v17 }
  0x7f   :  { %v71_v21 = vmul.f32 %v58_v20, %v43_v19 }
  0x81   :  { %v75_v24 = vmax.f32 %v71_v21, 0.0 }
  0x83   :  { %79 = vst [vmem:[%s162_s3 + $0x8] sm:$0xff] %v75_v24 }
  0x84   :  { %v68_v27 = vpop.permute.xlu1 %67  ;;  %v63_v28 = vpop.permute.xlu0 %62 }
  0x85   :  { %v73_v29 = vmul.f32 %v68_v27, %v45_v26  ;;  %v72_v30 = vmul.f32 %v63_v28, %v44_v25 }
  0x87   :  { %v77_v31 = vmax.f32 %v73_v29, 0.0  ;;  %v76_v32 = vmax.f32 %v72_v30, 0.0 }
  0x89   :  { %81 = vst [vmem:[%s162_s3 + $0x18] sm:$0xff] %v77_v31 }
  0x8a   :  { %80 = vst [vmem:[%s162_s3 + $0x10] sm:$0xff] %v76_v32 }

</bundles_post_ra>
